<compile_context>
chip_gen: v7x
topology: tpu7x:2x2x1
jax: 0.10.0
libtpu: 0.0.40
codegen_flags: <defaults>
</compile_context>

<pallas_src>
import jax
import jax.numpy as jnp
import numpy as np
from jax.experimental import pallas as pl
from jax.experimental.pallas import tpu as pltpu

EPS = 1e-5  # InstanceNorm2d default eps


def upsampling_block_kernel(x_ref, w_ref, scale_ref, shift_ref, out_ref):
    # x_ref     : (4*Cin, HW)   shifted-input channel groups [x, x_r, x_d, x_dr]
    # w_ref     : (4*Cout, 4*Cin) phase-stacked transposed-conv taps
    # scale_ref : (Cout, 1)     AdaIN scale (precomputed in wrapper)
    # shift_ref : (Cout, 1)     AdaIN shift (precomputed in wrapper)
    # out_ref   : (4, Cout, HW) phase-major output, lane dim = HW
    cout = scale_ref.shape[0]

    # --- all four sub-pixel phases of the transposed conv in one MXU matmul ---
    y = jnp.dot(w_ref[...], x_ref[...],
                preferred_element_type=jnp.float32)          # (4*Cout, HW)
    hw = y.shape[1]
    y = y.reshape(4, cout, hw)                                # free sublane regroup

    # --- InstanceNorm2d (affine=False): per-channel stats over ALL output
    #     spatial positions = over phase axis (0) and spatial axis (2) ---
    mean = jnp.mean(jnp.mean(y, axis=2, keepdims=True), axis=0, keepdims=True)
    d = y - mean
    var = jnp.mean(jnp.mean(d * d, axis=2, keepdims=True), axis=0, keepdims=True)
    y_n = d * jax.lax.rsqrt(var + EPS)                        # EUP rsqrt

    # --- AdaIN affine (per-channel column broadcast) + ReLU ---
    scale = scale_ref[...][None, :, :]                        # (1, Cout, 1)
    shift = shift_ref[...][None, :, :]
    out_ref[...] = jnp.maximum(scale * y_n + shift, 0.0)


def upsampling_block(x_nchw, params, style, inoise=None):
    del inoise  # unused in the PyTorch forward
    N, Cin, H, W = x_nchw.shape
    Cout = params["deconv_w"].shape[1]
    HW = H * W

    x = x_nchw.astype(jnp.float32)                            # stay NCHW (channel-major)

    # ---- shifted copies of the compact input (zero at the far boundary) ----
    zrow = jnp.zeros((N, Cin, 1, W), jnp.float32)
    zcol = jnp.zeros((N, Cin, H, 1), jnp.float32)
    x_r = jnp.concatenate([x[:, :, :, 1:], zcol], axis=3)     # x[iy,   ix+1]
    x_d = jnp.concatenate([x[:, :, 1:, :], zrow], axis=2)     # x[iy+1, ix  ]
    x_dr = jnp.concatenate([x_d[:, :, :, 1:], zcol], axis=3)  # x[iy+1, ix+1]
    X = jnp.concatenate([x, x_r, x_d, x_dr], axis=1).reshape(N, 4 * Cin, HW)

    # ---- phase-stacked weight (4*Cout, 4*Cin) from ConvTranspose2d weight ----
    # out[2m+py, 2n+px] taps (derived from oy = 2*iy + ky - 1, ox = 2*ix + kx - 1):
    #   (py,px)=(0,0): w[1,1]*x
    #   (0,1): w[1,2]*x + w[1,0]*x_r
    #   (1,0): w[2,1]*x + w[0,1]*x_d
    #   (1,1): w[2,2]*x + w[2,0]*x_r + w[0,2]*x_d + w[0,0]*x_dr
    wt = params["deconv_w"].astype(jnp.float32)               # (Cin, Cout, 3, 3)

    def tap(ky, kx):
        return wt[:, :, ky, kx].T                             # (Cout, Cin)

    Z = jnp.zeros((Cout, Cin), jnp.float32)
    W_all = jnp.concatenate([
        jnp.concatenate([tap(1, 1), Z,         Z,         Z        ], axis=1),  # (even, even)
        jnp.concatenate([tap(1, 2), tap(1, 0), Z,         Z        ], axis=1),  # (even, odd)
        jnp.concatenate([tap(2, 1), Z,         tap(0, 1), Z        ], axis=1),  # (odd, even)
        jnp.concatenate([tap(2, 2), tap(2, 0), tap(0, 2), tap(0, 0)], axis=1),  # (odd, odd)
    ], axis=0)                                                # (4*Cout, 4*Cin)

    # ---- style path hoisted out of the spatial kernel (tiny GEMMs) ----
    s2 = style.astype(jnp.float32) @ params["w2"] + params["b2"]       # (N, S)
    scale = (s2 @ params["ws"] + params["bs"])[:, :, None]             # (N, Cout, 1)
    shift = (s2 @ params["wsh"] + params["bsh"])[:, :, None]           # (N, Cout, 1)
    # deconv bias is a per-channel constant -> exactly cancelled by InstanceNorm.

    grid_spec = pltpu.PrefetchScalarGridSpec(
        num_scalar_prefetch=0,
        grid=(N,),
        in_specs=[
            pl.BlockSpec((pl.Squeezed(), 4 * Cin, HW), lambda n: (n, 0, 0)),   # X
            pl.BlockSpec((4 * Cout, 4 * Cin), lambda n: (0, 0)),               # W_all
            pl.BlockSpec((pl.Squeezed(), Cout, 1), lambda n: (n, 0, 0)),       # scale
            pl.BlockSpec((pl.Squeezed(), Cout, 1), lambda n: (n, 0, 0)),       # shift
        ],
        out_specs=pl.BlockSpec((pl.Squeezed(), 4, Cout, HW),
                               lambda n: (n, 0, 0, 0)),
    )

    out_ph = pl.pallas_call(
        upsampling_block_kernel,
        out_shape=jax.ShapeDtypeStruct((N, 4, Cout, HW), jnp.float32),
        grid_spec=grid_spec,
        compiler_params=pltpu.CompilerParams(
            dimension_semantics=("parallel",),       # batch -> 2 TCs on v7x
            vmem_limit_bytes=32 * 1024 * 1024,
        ),
    )(X, W_all, scale, shift)

    # phase interleave: (N, py, px, Cout, H, W) -> (N, Cout, 2H, 2W)
    out = out_ph.reshape(N, 2, 2, Cout, H, W)
    out = jnp.transpose(out, (0, 3, 4, 1, 5, 2)).reshape(N, Cout, 2 * H, 2 * W)
    return out


def reference(x_nchw, params, style):
    """Pure-JAX reference (uses XLA's conv_general_dilated for the deconv)."""
    wt = params["deconv_w"]                                            # (Cin,Cout,3,3)
    w_conv = jnp.transpose(wt[:, :, ::-1, ::-1], (1, 0, 2, 3))         # (Cout,Cin,3,3)
    y = jax.lax.conv_general_dilated(
        x_nchw, w_conv, window_strides=(1, 1),
        padding=((1, 2), (1, 2)), lhs_dilation=(2, 2),
        dimension_numbers=("NCHW", "OIHW", "NCHW"))
    y = y + params["deconv_b"][None, :, None, None]
    mean = jnp.mean(y, axis=(2, 3), keepdims=True)
    var = jnp.mean(jnp.square(y - mean), axis=(2, 3), keepdims=True)
    y_n = (y - mean) / jnp.sqrt(var + EPS)
    s2 = style @ params["w2"] + params["b2"]
    scale = (s2 @ params["ws"] + params["bs"])[:, :, None, None]
    shift = (s2 @ params["wsh"] + params["bsh"])[:, :, None, None]
    return jnp.maximum(scale * y_n + shift, 0.0)


if __name__ == "__main__":
    key = jax.random.PRNGKey(0)
    N, Cin, H, W = 2, 4, 16, 16      # input:  (2, 4, 16, 16)  NCHW
    Cout, S = 8, 16                  # output: (2, 8, 32, 32)  NCHW
    keys = jax.random.split(key, 12)

    x = jax.random.normal(keys[0], (N, Cin, H, W), jnp.float32)
    style = jax.random.normal(keys[1], (N, S), jnp.float32)
    inoise = jax.random.normal(keys[2], (N, 1), jnp.float32)            # unused in forward

    params = {
        # ConvTranspose2d weight layout (in_features, out_features, kH, kW), plus bias
        "deconv_w": 0.1 * jax.random.normal(keys[3], (Cin, Cout, 3, 3), jnp.float32),
        "deconv_b": 0.1 * jax.random.normal(keys[4], (Cout,), jnp.float32),
        # Linear weights stored as W^T (in, out) + bias
        "w2":  0.1 * jax.random.normal(keys[5], (S, S), jnp.float32),
        "b2":  0.1 * jax.random.normal(keys[6], (S,), jnp.float32),
        "ws":  0.1 * jax.random.normal(keys[7], (S, Cout), jnp.float32),
        "bs":  0.1 * jax.random.normal(keys[8], (Cout,), jnp.float32),
        "wsh": 0.1 * jax.random.normal(keys[9], (S, Cout), jnp.float32),
        "bsh": 0.1 * jax.random.normal(keys[10], (Cout,), jnp.float32),
        # to_noise = Linear(1, Cout): defined in __init__ but unused in forward
        "to_noise_w": 0.1 * jax.random.normal(keys[11], (1, Cout), jnp.float32),
    }

    out = upsampling_block(x, params, style, inoise)
    jax.block_until_ready(out)

    ref = reference(x, params, style)
    np.testing.assert_allclose(np.asarray(out), np.asarray(ref), rtol=1e-4, atol=1e-4)
    print("KERNEL_OK")
</pallas_src>

<mosaic_0001>
module attributes {stable_mosaic.version = 11 : i64} {
  func.func @upsampling_block_kernel(%arg0: i32, %arg1: memref<1x16x256xf32, #tpu.memory_space<vmem>>, %arg2: memref<32x16xf32, #tpu.memory_space<vmem>>, %arg3: memref<1x8x1xf32, #tpu.memory_space<vmem>>, %arg4: memref<1x8x1xf32, #tpu.memory_space<vmem>>, %arg5: memref<1x4x8x256xf32, #tpu.memory_space<vmem>>) attributes {dimension_semantics = [#tpu.dimension_semantics<parallel>], iteration_bounds = array<i64: 2>, scalar_prefetch = 0 : i64, scratch_operands = 0 : i64, tpu.core_type = #tpu.core_type<tc>, window_params = [{transform_indices = @transform_0, window_bounds = array<i64: 1, 16, 256>}, {pipeline_mode = #tpu.pipeline_mode<synchronous>, transform_indices = @transform_1, window_bounds = array<i64: 32, 16>}, {transform_indices = @transform_2, window_bounds = array<i64: 1, 8, 1>}, {transform_indices = @transform_3, window_bounds = array<i64: 1, 8, 1>}, {transform_indices = @transform_4, window_bounds = array<i64: 1, 4, 8, 256>}]} {
    %c0 = arith.constant 0 : index
    %c0_0 = arith.constant 0 : index
    %0 = vector.load %arg2[%c0, %c0_0] : memref<32x16xf32, #tpu.memory_space<vmem>>, vector<32x16xf32>
    %c0_1 = arith.constant 0 : index
    %c0_2 = arith.constant 0 : index
    %c0_3 = arith.constant 0 : index
    %1 = vector.load %arg1[%c0_1, %c0_2, %c0_3] : memref<1x16x256xf32, #tpu.memory_space<vmem>>, vector<1x16x256xf32>
    %2 = vector.shape_cast %1 : vector<1x16x256xf32> to vector<16x256xf32>
    %cst = arith.constant dense<0.000000e+00> : vector<32x256xf32>
    %3 = tpu.matmul %0, %2, %cst {dimension_numbers = #tpu.dot_dimension_numbers<[1], [0], [0], [1], [0, 0, 1, 1], [], []>} : vector<32x16xf32>, vector<16x256xf32>, vector<32x256xf32> -> vector<32x256xf32>
    %4 = vector.shape_cast %3 : vector<32x256xf32> to vector<4x8x256xf32>
    %cst_4 = arith.constant dense<0.000000e+00> : vector<4x8xf32>
    %5 = vector.multi_reduction <add>, %4, %cst_4 [2] : vector<4x8x256xf32> to vector<4x8xf32>
    %6 = vector.shape_cast %5 : vector<4x8xf32> to vector<4x8x1xf32>
    %cst_5 = arith.constant 2.560000e+02 : f32
    %7 = vector.broadcast %cst_5 : f32 to vector<4x8x1xf32>
    %8 = arith.divf %6, %7 : vector<4x8x1xf32>
    %cst_6 = arith.constant dense<0.000000e+00> : vector<8x1xf32>
    %9 = vector.multi_reduction <add>, %8, %cst_6 [0] : vector<4x8x1xf32> to vector<8x1xf32>
    %10 = vector.shape_cast %9 : vector<8x1xf32> to vector<1x8x1xf32>
    %cst_7 = arith.constant 4.000000e+00 : f32
    %11 = vector.broadcast %cst_7 : f32 to vector<1x8x1xf32>
    %12 = arith.divf %10, %11 : vector<1x8x1xf32>
    %13 = vector.broadcast %12 : vector<1x8x1xf32> to vector<4x8x256xf32>
    %14 = arith.subf %4, %13 : vector<4x8x256xf32>
    %15 = arith.mulf %14, %14 : vector<4x8x256xf32>
    %cst_8 = arith.constant dense<0.000000e+00> : vector<4x8xf32>
    %16 = vector.multi_reduction <add>, %15, %cst_8 [2] : vector<4x8x256xf32> to vector<4x8xf32>
    %17 = vector.shape_cast %16 : vector<4x8xf32> to vector<4x8x1xf32>
    %cst_9 = arith.constant 2.560000e+02 : f32
    %18 = vector.broadcast %cst_9 : f32 to vector<4x8x1xf32>
    %19 = arith.divf %17, %18 : vector<4x8x1xf32>
    %cst_10 = arith.constant dense<0.000000e+00> : vector<8x1xf32>
    %20 = vector.multi_reduction <add>, %19, %cst_10 [0] : vector<4x8x1xf32> to vector<8x1xf32>
    %21 = vector.shape_cast %20 : vector<8x1xf32> to vector<1x8x1xf32>
    %cst_11 = arith.constant 4.000000e+00 : f32
    %22 = vector.broadcast %cst_11 : f32 to vector<1x8x1xf32>
    %23 = arith.divf %21, %22 : vector<1x8x1xf32>
    %cst_12 = arith.constant 9.99999974E-6 : f32
    %24 = vector.broadcast %cst_12 : f32 to vector<1x8x1xf32>
    %25 = arith.addf %23, %24 : vector<1x8x1xf32>
    %26 = math.rsqrt %25 : vector<1x8x1xf32>
    %27 = vector.broadcast %26 : vector<1x8x1xf32> to vector<4x8x256xf32>
    %28 = arith.mulf %14, %27 : vector<4x8x256xf32>
    %c0_13 = arith.constant 0 : index
    %c0_14 = arith.constant 0 : index
    %c0_15 = arith.constant 0 : index
    %29 = vector.load %arg3[%c0_13, %c0_14, %c0_15] : memref<1x8x1xf32, #tpu.memory_space<vmem>>, vector<1x8x1xf32>
    %30 = vector.shape_cast %29 : vector<1x8x1xf32> to vector<8x1xf32>
    %31 = vector.shape_cast %30 : vector<8x1xf32> to vector<1x8x1xf32>
    %c0_16 = arith.constant 0 : index
    %c0_17 = arith.constant 0 : index
    %c0_18 = arith.constant 0 : index
    %32 = vector.load %arg4[%c0_16, %c0_17, %c0_18] : memref<1x8x1xf32, #tpu.memory_space<vmem>>, vector<1x8x1xf32>
    %33 = vector.shape_cast %32 : vector<1x8x1xf32> to vector<8x1xf32>
    %34 = vector.shape_cast %33 : vector<8x1xf32> to vector<1x8x1xf32>
    %35 = vector.broadcast %31 : vector<1x8x1xf32> to vector<4x8x256xf32>
    %36 = arith.mulf %35, %28 : vector<4x8x256xf32>
    %37 = vector.broadcast %34 : vector<1x8x1xf32> to vector<4x8x256xf32>
    %38 = arith.addf %36, %37 : vector<4x8x256xf32>
    %cst_19 = arith.constant 0.000000e+00 : f32
    %39 = vector.broadcast %cst_19 : f32 to vector<4x8x256xf32>
    %40 = arith.maximumf %38, %39 : vector<4x8x256xf32>
    %c0_20 = arith.constant 0 : index
    %c0_21 = arith.constant 0 : index
    %c0_22 = arith.constant 0 : index
    %c0_23 = arith.constant 0 : index
    %41 = vector.load %arg5[%c0_20, %c0_21, %c0_22, %c0_23] : memref<1x4x8x256xf32, #tpu.memory_space<vmem>>, vector<1x4x8x256xf32>
    %42 = vector.shape_cast %41 : vector<1x4x8x256xf32> to vector<4x8x256xf32>
    %43 = vector.shape_cast %40 : vector<4x8x256xf32> to vector<1x4x8x256xf32>
    tpu.vector_store %arg5[%c0_20, %c0_21, %c0_22, %c0_23], %43 {strides = array<i32>} : memref<1x4x8x256xf32, #tpu.memory_space<vmem>>, vector<1x4x8x256xf32>,
    return
  }
  func.func @transform_0(%arg0: i32) -> (i32, i32, i32) {
    %c0_i32 = arith.constant 0 : i32
    %c0_i32_0 = arith.constant 0 : i32
    %c0_i32_1 = arith.constant 0 : i32
    return %arg0, %c0_i32, %c0_i32_0 : i32, i32, i32
  }
  func.func @transform_1(%arg0: i32) -> (i32, i32) {
    %c0_i32 = arith.constant 0 : i32
    %c0_i32_0 = arith.constant 0 : i32
    %c0_i32_1 = arith.constant 0 : i32
    return %c0_i32, %c0_i32_0 : i32, i32
  }
  func.func @transform_2(%arg0: i32) -> (i32, i32, i32) {
    %c0_i32 = arith.constant 0 : i32
    %c0_i32_0 = arith.constant 0 : i32
    %c0_i32_1 = arith.constant 0 : i32
    return %arg0, %c0_i32, %c0_i32_0 : i32, i32, i32
  }
  func.func @transform_3(%arg0: i32) -> (i32, i32, i32) {
    %c0_i32 = arith.constant 0 : i32
    %c0_i32_0 = arith.constant 0 : i32
    %c0_i32_1 = arith.constant 0 : i32
    return %arg0, %c0_i32, %c0_i32_0 : i32, i32, i32
  }
  func.func @transform_4(%arg0: i32) -> (i32, i32, i32, i32) {
    %c0_i32 = arith.constant 0 : i32
    %c0_i32_0 = arith.constant 0 : i32
    %c0_i32_1 = arith.constant 0 : i32
    %c0_i32_2 = arith.constant 0 : i32
    return %arg0, %c0_i32, %c0_i32_0, %c0_i32_1 : i32, i32, i32, i32
  }
}

</mosaic_0001>

<bundles_post_ra>
// kernel: tpu_custom_call.1
= control target key start
LH: loop header
LB: loop body
LE: loop exit
PB: predicated region body
PF: predicated region fallthrough
CT: control target
= control target key end

     0   :  { %9 = vsyncpa [#allocation3], 0  ;;  %s848_s0 = inlined_call_operand.vmem [shape: f32[2,16,256], index: 0, kind: input, shape index: {}]   ;;  %s849_s1 = inlined_call_operand.vmem [shape: f32[32,16], index: 1, kind: input, shape index: {}]   ;;  %s850_s2 = inlined_call_operand.vmem [shape: f32[2,8,1], index: 2, kind: input, shape index: {}]   ;;  %s851_s3 = inlined_call_operand.vmem [shape: f32[2,8,1], index: 3, kind: input, shape index: {}]   ;;  %s852_s4 = inlined_call_operand.hbm [shape: f32[2,4,8,256], index: 4, kind: output, shape index: {}]  }
   0x1   :  { %11 = vsyncpa [#allocation3 + $0x1], 0  ;;  %s719_s15 = smov 0   ;;  %s721_s16 = smov 0  }
   0x2   :  { %s723_s17 = smov 0   ;;  %s725_s18 = smov 0  }
   0x3 LB: > { %s740_s19 = sadd.s32 4294967295, %s687_s18   ;;  %s552_s20 = sadd.s32 4294967294, %s687_s18   ;;  %s687_s18 = sphi %s725_s18, %s858_s18   ;;  %s683_s17 = sphi %s723_s17, %s857_s17   ;;  %s679_s16 = sphi %s721_s16, %s856_s16   ;;  %s675_s15 = sphi %s719_s15, %s855_s15  }
   0x4   : > { %s744_s21 = sadd.s32 1, %s687_s18   ;;  %s123_s22 = sadd.s32 1, %s683_s17 }
   0x5   : > { %s120_s23 = ssub.s32 %s687_s18, %s744_s21  ;;  %p133_p0 = scmp.ne.s32.totalorder %s683_s17, %s679_s16 }
   0x6   : > { %p121_p1 = scmp.eq.s32.totalorder %s120_s23, 0  ;;  %p134_p2 = scmp.eq.s32.totalorder %s740_s19, 1 }
   0x7   : > { %p139_p3 = scmp.ne.s32.totalorder %s679_s16, %s675_s15  ;;  %p140_p4 = scmp.eq.s32.totalorder %s552_s20, 1 }
   0x8   : > { %s755_s24 = scalar_select %p121_p1, %s683_s17, %s123_s22  }
   0x9   : > { %p757_p5 = por %p134_p2, %p133_p0  ;;  %p761_p6 = por %p140_p4, %p139_p3 }
   0xa   : > { %p555_p7 = scmp.ge.s32.totalorder %s687_s18, 1  ;;  %p183_p8 = scmp.lt.s32.totalorder %s687_s18, 3 }
   0xc   : > { %p184_p9 = pnand %p555_p7, %p183_p8 }
   0xd   : > { %p217_p10 = scmp.lt.s32.totalorder (!%p184_p9), %s740_s19, 1  ;;  %v689_v0 = vmov (!%p184_p9), 0.0   ;;  %v230_v7 = vld [vmem:[%s849_s1] sm:$0xff] (!%p184_p9)  ;;  %vm238_vm0 = vcmask (!%p184_p9), 130048   ;;  %v232_v8 = vld [vmem:[%s849_s1 + $0x10] sm:$0xff] (!%p184_p9)  ;;  %v231_v9 = vld [vmem:[%s849_s1 + $0x8] sm:$0xff] (!%p184_p9) }
   0xe   : > { %187 = sbr.rel (%p184_p9) target bundleno = 602 (0x25a), region = 36  ;;  %315 = vmatprep.mubr.f32.mxu0 (!%p184_p9), %v689_v0  ;;  %327 = vmatprep.mubr.f32.mxu1 (!%p184_p9), %v689_v0  ;;  %v233_v10 = vld [vmem:[%s849_s1 + $0x18] sm:$0xff] (!%p184_p9)  ;;  %v690_v23 = vmov (!%p184_p9), 0   ;;  %s571_s6 = sshll.u32 (!%p184_p9), %s740_s19, 10 }
   0xf   : > { %621 = vset.pattern.permute.xlu0 (!%p184_p9), %v690_v23  ;;  %622 = vset.pattern.permute.xlu1 (!%p184_p9), %v690_v23  ;;  %s801_s11 = scalar_lea.hbm (!%p184_p9), %s852_s4, %s571_s6  ;;  %s691_s13 = smov (!%p184_p9), [#allocation2]  }
  0x15   : > { %s769_s27 = scalar_select %p217_p10, %s740_s19, 1 }
  0x17   : > { %s570_s28 = sshll.u32 %s769_s27, 5  ;;  %s559_s14 = sshll.u32 %s769_s27, 3 }
  0x18   : > { %s221_s5 = scalar_lea.vmem %s848_s0, %s570_s28  ;;  %s229_s23 = scalar_lea.vmem %s851_s3, %s559_s14 }
  0x19   : > { %v235_v1 = vld [vmem:[%s221_s5 + $0x8] sm:$0xff]  ;;  %v237_v2 = vld [vmem:[%s221_s5 + $0x18] sm:$0xff]  ;;  %v234_v3 = vld [vmem:[%s221_s5] sm:$0xff]  ;;  %s225_s30 = scalar_lea.vmem %s850_s2, %s559_s14  ;;  %s214_s27 = sand.u32 1, %s679_s16  }
  0x1a   : > { %v572_v4 = vpack.c.bf16 %v237_v2, %v235_v1  ;;  %v236_v5 = vld [vmem:[%s221_s5 + $0x10] sm:$0xff]  ;;  %v409_v56 = vld [vmem:[%s229_s23] sm:$0xff]  ;;  %s556_s5 = sshll.u32 %s214_s27, 6  ;;  %s807_s19 = scalar_lea.sflag [#allocation3], %s214_s27 }
  0x1b   : > { %v574_v6 = vpack.c.bf16 %v236_v5, %v234_v3  ;;  %v408_v57 = vld [vmem:[%s225_s30] sm:$0xff]  ;;  %s216_s7 = scalar_lea.vmem [#allocation2], %s556_s5  ;;  %s629_s14 = sshll.u32 %s691_s13, 4  ;;  %s630_s14 = int_to_ptr.vmem [resolvable:$false] %s629_s14 }
  0x1c   : > { %573 = vmatprep.subr.bf16.mxu0 %v572_v4  ;;  %576 = vmatprep.subr.bf16.mxu1 %v572_v4  ;;  %s466_s8 = sshll.u32 %s216_s7, 4  ;;  %s631_s20 = scalar_lea.vmem %s630_s14, 2048  ;;  %s803_s8 = int_to_ptr.vmem [resolvable:$true] %s466_s8 }
  0x1d   : > { %575 = vmatpush1.bf16.msra.mxu0 %v574_v6  ;;  %577 = vmatpush1.bf16.msra.mxu1 %v574_v6  ;;  %s625_s12 = scalar_lea.vmem %s803_s8, 1024  ;;  %p632_p0 = scmp.lt.s32.totalorder %s803_s8, %s630_s14 }
  0x1e   : > { %p626_p11 = scmp.ne.s32.totalorder %s803_s8, %s625_s12  ;;  %p633_p1 = scmp.lt.s32.totalorder %s631_s20, %s625_s12 }
  0x20   : > { %561 = vmatmul.mubr.msk.f32.vlgmr.msra.gmra.mrb[0].mxu0 %vm238_vm0, %v230_v7  ;;  %563 = vmatmul.mubr.msk.f32.vlgmr.msra.gmra.mrb[0].mxu1 %vm238_vm0, %v232_v8  ;;  %p627_p12 = pnand %p626_p11, %p757_p5  ;;  %p634_p2 = por %p633_p1, %p632_p0 }
  0x21   : > { %321 = vmatprep.mubr.f32.mxu0 %v689_v0  ;;  %333 = vmatprep.mubr.f32.mxu1 %v689_v0 }
  0x22   : > { %p628_p13 = pneg %p627_p12 }
  0x24   : > { %562 = vmatmul.mubr.msk.f32.gmra.mrb[2].mxu0 %vm238_vm0, %v231_v9  ;;  %564 = vmatmul.mubr.msk.f32.gmra.mrb[2].mxu1 %vm238_vm0, %v233_v10  ;;  %p635_p3 = pnand %p634_p2, %p628_p13 }
  0xf3   : > { %v317_v11 = vpop.f32.mrb[0].mxu0  ;;  %v329_v12 = vpop.f32.mrb[0].mxu1 }
  0xf4   : > { %v319_v13 = vpop.f32.mrb[1].mxu0  ;;  %v331_v14 = vpop.f32.mrb[1].mxu1 }
  0xf5   : > { %v340_v15 = vadd.f32 %v319_v13, %v317_v11  ;;  %v346_v16 = vadd.f32 %v331_v14, %v329_v12 }
  0xf7   : > { %341 = vadd.xlane.f32.xlu0 %v340_v15  ;;  %v323_v17 = vpop.f32.mrb[2].mxu0  ;;  %347 = vadd.xlane.f32.xlu1 %v346_v16  ;;  %v335_v18 = vpop.f32.mrb[2].mxu1 }
  0xf8   : > { %v325_v19 = vpop.f32.mrb[3].mxu0  ;;  %v337_v20 = vpop.f32.mrb[3].mxu1 }
  0xf9   : > { %v343_v21 = vadd.f32 %v325_v19, %v323_v17  ;;  %v349_v22 = vadd.f32 %v337_v20, %v335_v18 }
  0xfb   : > { %344 = vadd.xlane.f32.xlu0 %v343_v21  ;;  %350 = vadd.xlane.f32.xlu1 %v349_v22 }
 0x184   : > { %v342_v24 = vpop.xlane.xlu0 %341  ;;  %v348_v25 = vpop.xlane.xlu1 %347 }
 0x185   : > { %v353_v28 = vmul.f32 0.00390625, %v342_v24  ;;  %v355_v30 = vmul.f32 0.00390625, %v348_v25 }
 0x188   : > { %v345_v26 = vpop.xlane.xlu0 %344  ;;  %v351_v27 = vpop.xlane.xlu1 %350 }
 0x189   : > { %v354_v29 = vmul.f32 0.00390625, %v345_v26  ;;  %v356_v32 = vmul.f32 0.00390625, %v351_v27 }
 0x18b   : > { %v357_v31 = vadd.f32 %v354_v29, %v353_v28 }
 0x18d   : > { %v358_v33 = vadd.f32 %v357_v31, %v355_v30 }
 0x18f   : > { %v359_v34 = vadd.f32 %v358_v33, %v356_v32 }
 0x191   : > { %v361_v35 = vmul.f32 0.25, %v359_v34 }
 0x193   : > { %v364_v36 = vsub.f32 %v323_v17, %v361_v35  ;;  %v365_v37 = vsub.f32 %v325_v19, %v361_v35  ;;  %v362_v38 = vsub.f32 %v317_v11, %v361_v35  ;;  %v363_v39 = vsub.f32 %v319_v13, %v361_v35 }
 0x194   : > { %v368_v40 = vsub.f32 %v335_v18, %v361_v35  ;;  %v369_v41 = vsub.f32 %v337_v20, %v361_v35  ;;  %v366_v42 = vsub.f32 %v329_v12, %v361_v35  ;;  %v367_v43 = vsub.f32 %v331_v14, %v361_v35 }
 0x195   : > { %v372_v44 = vmul.f32 %v364_v36, %v364_v36  ;;  %v373_v45 = vmul.f32 %v365_v37, %v365_v37  ;;  %v370_v46 = vmul.f32 %v362_v38, %v362_v38  ;;  %v371_v47 = vmul.f32 %v363_v39, %v363_v39 }
 0x196   : > { %v376_v48 = vmul.f32 %v368_v40, %v368_v40  ;;  %v377_v49 = vmul.f32 %v369_v41, %v369_v41  ;;  %v374_v52 = vmul.f32 %v366_v42, %v366_v42  ;;  %v375_v53 = vmul.f32 %v367_v43, %v367_v43 }
 0x197   : > { %v381_v50 = vadd.f32 %v373_v45, %v372_v44  ;;  %v378_v51 = vadd.f32 %v371_v47, %v370_v46 }
 0x198   : > { %v387_v54 = vadd.f32 %v377_v49, %v376_v48  ;;  %v384_v55 = vadd.f32 %v375_v53, %v374_v52 }
 0x199   : > { %382 = vadd.xlane.f32.xlu1 %v381_v50  ;;  %379 = vadd.xlane.f32.xlu0 %v378_v51 }
 0x19d   : > { %388 = vadd.xlane.f32.xlu1 %v387_v54  ;;  %385 = vadd.xlane.f32.xlu0 %v384_v55 }
 0x1ae   : > { %425 = vperm.xlu1 %622, %v409_v56  }
 0x1b3   : > { %412 = vperm.xlu0 %621, %v408_v57  }
 0x226   : > { %v383_v58 = vpop.xlane.xlu1 %382  ;;  %v380_v59 = vpop.xlane.xlu0 %379 }
 0x227   : > { %v391_v60 = vmul.f32 0.00390625, %v383_v58  ;;  %v390_v61 = vmul.f32 0.00390625, %v380_v59 }
 0x229   : > { %v394_v0 = vadd.f32 %v391_v60, %v390_v61 }
 0x22a   : > { %v389_v62 = vpop.xlane.xlu1 %388  ;;  %v386_v63 = vpop.xlane.xlu0 %385 }
 0x22b   : > { %v392_v1 = vmul.f32 0.00390625, %v386_v63  ;;  %v393_v2 = vmul.f32 0.00390625, %v389_v62 }
 0x22d   : > { %v395_v3 = vadd.f32 %v394_v0, %v392_v1 }
 0x22e   : > { %v426_v17 = vpop.permute.xlu1 %425 }
 0x22f   : > { %v396_v4 = vadd.f32 %v395_v3, %v393_v2 }
 0x231   : > { %v397_v5 = vmul.f32 0.25, %v396_v4 }
 0x232   : > { %v413_v8 = vpop.permute.xlu0 %412 }
 0x233   : > { %v398_v6 = vadd.f32 1e-05, %v397_v5 }
 0x235   : > { %623 = vrsqrt.f32 %v398_v6 }
 0x23f   : > { %v624_v7 = vpop.eup %623 }
 0x240   : > { %v400_v9 = vmul.f32 %v624_v7, %v362_v38  ;;  %v401_v10 = vmul.f32 %v624_v7, %v363_v39  ;;  %v402_v11 = vmul.f32 %v624_v7, %v364_v36  ;;  %v403_v12 = vmul.f32 %v624_v7, %v365_v37 }
 0x241   : > { %v404_v13 = vmul.f32 %v624_v7, %v366_v42  ;;  %v405_v14 = vmul.f32 %v624_v7, %v367_v43  ;;  %v406_v15 = vmul.f32 %v624_v7, %v368_v40  ;;  %v407_v16 = vmul.f32 %v624_v7, %v369_v41 }
 0x242   : > { %v415_v18 = vmul.f32 %v413_v8, %v400_v9  ;;  %v416_v19 = vmul.f32 %v413_v8, %v401_v10  ;;  %v417_v20 = vmul.f32 %v413_v8, %v402_v11  ;;  %v418_v21 = vmul.f32 %v413_v8, %v403_v12 }
 0x243   : > { %v419_v22 = vmul.f32 %v413_v8, %v404_v13  ;;  %v420_v23 = vmul.f32 %v413_v8, %v405_v14  ;;  %v421_v24 = vmul.f32 %v413_v8, %v406_v15  ;;  %v422_v25 = vmul.f32 %v413_v8, %v407_v16 }
 0x244   : > { %v428_v26 = vadd.f32 %v426_v17, %v415_v18  ;;  %v429_v27 = vadd.f32 %v426_v17, %v416_v19  ;;  %v430_v28 = vadd.f32 %v426_v17, %v417_v20  ;;  %v431_v29 = vadd.f32 %v426_v17, %v418_v21 }
 0x245   : > { %v432_v30 = vadd.f32 %v426_v17, %v419_v22  ;;  %v433_v31 = vadd.f32 %v426_v17, %v420_v23  ;;  %v434_v32 = vadd.f32 %v426_v17, %v421_v24  ;;  %v435_v33 = vadd.f32 %v426_v17, %v422_v25 }
 0x246   : > { %v436_v34 = vmax.f32 %v428_v26, 0.0  ;;  %v437_v35 = vmax.f32 %v429_v27, 0.0  ;;  %v438_v36 = vmax.f32 %v430_v28, 0.0  ;;  %v439_v37 = vmax.f32 %v431_v29, 0.0 }
 0x247   : > { %v440_v38 = vmax.f32 %v432_v30, 0.0  ;;  %v441_v39 = vmax.f32 %v433_v31, 0.0  ;;  %v442_v40 = vmax.f32 %v434_v32, 0.0  ;;  %v443_v41 = vmax.f32 %v435_v33, 0.0 }
 0x248   : > { %444 = vst [vmem:[%s216_s7] sm:$0xff] %v436_v34  ;;  %445 = vst [vmem:[%s216_s7 + $0x8] sm:$0xff] %v437_v35 }
 0x249   : > { %446 = vst [vmem:[%s216_s7 + $0x10] sm:$0xff] %v438_v36  ;;  %447 = vst [vmem:[%s216_s7 + $0x18] sm:$0xff] %v439_v37 }
 0x24a   : > { %448 = vst [vmem:[%s216_s7 + $0x20] sm:$0xff] %v440_v38  ;;  %449 = vst [vmem:[%s216_s7 + $0x28] sm:$0xff] %v441_v39 }
 0x24b   : > { %450 = vst [vmem:[%s216_s7 + $0x30] sm:$0xff] %v442_v40  ;;  %451 = vst [vmem:[%s216_s7 + $0x38] sm:$0xff] %v443_v41 }
 0x24c   : > { %638 = shalt.err (!%p635_p3)
}
 0x24d   : > { %s639_s22 = scalar_lea.hbm %s801_s11, 1024  ;;  %s643_s29 = scalar_lea.hbm %s852_s4, 2048 }
 0x24e   : > { %p640_p4 = scmp.ne.s32.totalorder %s801_s11, %s639_s22  ;;  %p644_p9 = scmp.lt.u32.totalorder %s801_s11, %s852_s4 }
 0x24f   : > { %p645_p10 = scmp.lt.u32.totalorder %s643_s29, %s639_s22  ;;  %p647_p12 = scmp.lt.u32.totalorder %s639_s22, %s801_s11 }
 0x250   : > { %p641_p7 = pnand %p640_p4, %p757_p5 }
 0x251   : > { %p646_p11 = por %p645_p10, %p644_p9 }
 0x252   : > { %p642_p8 = pneg %p641_p7 }
 0x253   : > { %p648_p13 = por %p647_p12, %p646_p11 }
 0x255   : > { %p649_p0 = pnand %p648_p13, %p642_p8 }
 0x257   : > { %652 = shalt.err (!%p649_p0)
}
 0x258   : > { %s692_s5 = smov 256   ;;  %s693_s6 = smov 16  }
 0x259   : > { %578 = dma.vmem_to_hbm [thread:$0]  (%p757_p5), %s803_s8, 1024, %s801_s11, %s807_s19, %s692_s5, %s692_s5, %s693_s6  }
 0x25a PF: > { %p584_p1 = scmp.ge.s32.totalorder %s687_s18, 2  ;;  %s481_s7 = sand.u32 1, %s675_s15  }
 0x25b   : > { %s482_s9 = scalar_lea.sflag [#allocation3], %s481_s7 }
 0x25c   : > { %p581_p2 = pnand %p584_p1, %p761_p6 }
 0x25e   : > { %670 = dma.done.wait (!%p581_p2), %s482_s9, 1024  }
 0x25f   : > { %672 = vsyncadd (!%p581_p2), %s482_s9, 4294966272  ;;  %p14_p3 = scmp.ge.s32.totalorder %s744_s21, 4   ;;  %s855_s15 = smov %s679_s16 }
 0x260   : > { %s856_s16 = smov %s683_s17  ;;  %s857_s17 = smov %s755_s24 }
 0x261   : > { %s858_s18 = smov %s744_s21  ;;  %16 = sbr.rel (!%p14_p3) target bundleno = 3 (0x3), region = 77 }
 0x268   :  { %487 = vsyncpa [#allocation3], 1 }
 0x269   :  { %489 = vsyncpa [#allocation3 + $0x1], 1 }

</bundles_post_ra>
